<compile_context>
chip_gen: v7x
topology: tpu7x:2x2x1
jax: 0.10.0
libtpu: 0.0.40
codegen_flags: <defaults>
</compile_context>

<pallas_src>
import math

import jax
import jax.numpy as jnp
from jax.experimental import pallas as pl
from jax.experimental.pallas import tpu as pltpu


# --------------------------------------------------------------------------
# Kernel 1: fused QKV projection  (rows, D) @ (D, 3*Dp) + bias  -> bf16 slab
# --------------------------------------------------------------------------
def _qkv_proj_kernel(x_ref, w_ref, b_ref, qkv_ref, acc_ref):
    @pl.when(pl.program_id(1) == 0)
    def _init():
        acc_ref[...] = jnp.zeros_like(acc_ref)

    acc_ref[...] += jnp.dot(x_ref[...], w_ref[...],
                            preferred_element_type=jnp.float32)

    @pl.when(pl.program_id(1) == pl.num_programs(1) - 1)
    def _finalize():
        qkv_ref[...] = (acc_ref[...] + b_ref[...]).astype(qkv_ref.dtype)


# --------------------------------------------------------------------------
# Kernel 2: flash attention (online softmax over kv tiles)
# --------------------------------------------------------------------------
def _flash_attn_kernel(q_ref, k_ref, v_ref, o_ref, m_scr, l_scr, acc_scr):
    ki = pl.program_id(2)

    @pl.when(ki == 0)
    def _init():
        m_scr[...] = jnp.full_like(m_scr, -jnp.inf)
        l_scr[...] = jnp.zeros_like(l_scr)
        acc_scr[...] = jnp.zeros_like(acc_scr)

    # scores = Q @ K^T : contract feature dims directly (no explicit transpose).
    # The 1/dim**0.25 scale is already folded into the Q projection.
    s = jax.lax.dot_general(q_ref[...], k_ref[...],
                            dimension_numbers=(((1,), (1,)), ((), ())),
                            preferred_element_type=jnp.float32)   # (tq, tkv) f32

    m_prev = m_scr[...]
    m_new = jnp.maximum(m_prev, jnp.max(s, axis=-1, keepdims=True))
    alpha = jnp.exp(m_prev - m_new)                               # == 0 at ki == 0
    p = jnp.exp(s - m_new)

    l_scr[...] = alpha * l_scr[...] + jnp.sum(p, axis=-1, keepdims=True)
    acc_scr[...] = alpha * acc_scr[...] + jnp.dot(
        p.astype(v_ref.dtype), v_ref[...], preferred_element_type=jnp.float32)
    m_scr[...] = m_new

    @pl.when(ki == pl.num_programs(2) - 1)
    def _finalize():
        inv_l = pl.reciprocal(l_scr[...], approx=False)           # exact, once per q tile
        o_ref[...] = (acc_scr[...] * inv_l).astype(o_ref.dtype)


# --------------------------------------------------------------------------
# Tile pickers
# --------------------------------------------------------------------------
def _pick_row_tile(n, target):
    """Largest multiple-of-8 divisor of n that is <= target; falls back to n."""
    best = None
    t = 8
    limit = min(n, target)
    while t <= limit:
        if n % t == 0:
            best = t
        t += 8
    return best if best is not None else n


def _pick_k_tile(d, target=512):
    """Largest multiple-of-128 divisor of d that is <= target; falls back to d."""
    best = None
    t = 128
    limit = min(d, target)
    while t <= limit:
        if d % t == 0:
            best = t
        t += 128
    return best if best is not None else d


# --------------------------------------------------------------------------
# Wrapper
# --------------------------------------------------------------------------
def attention_pallas(x, wq, bq, wk, bk, wv, bv):
    """x: (B, S, D) float32.  Weights (D, D) in PyTorch nn.Linear layout
    (y = x @ W^T + b); biases (D,)."""
    B, S, D = x.shape
    assert S % 8 == 0 or B == 1, (
        "S must be a multiple of 8 (sublane tile) when B > 1")

    scale = 1.0 / (D ** 0.25)                 # divide scores by sqrt(sqrt(dim))
    Dp = ((D + 127) // 128) * 128             # lane-tile-padded feature width

    # ---- fuse + pad parameters; fold the score scale into WQ / bQ ----
    def pad_cols(w2d):                        # (D, D) -> (D, Dp)
        return jnp.pad(w2d, ((0, 0), (0, Dp - D)))

    def pad_vec(v1d):                         # (D,) -> (Dp,)
        return jnp.pad(v1d, (0, Dp - D))

    w_fused = jnp.concatenate(
        [pad_cols(wq.T * scale), pad_cols(wk.T), pad_cols(wv.T)],
        axis=1).astype(jnp.bfloat16)                               # (D, 3*Dp)
    b_fused = jnp.concatenate(
        [pad_vec(bq * scale), pad_vec(bk), pad_vec(bv)]
    ).reshape(1, 3 * Dp).astype(jnp.float32)                       # (1, 3*Dp)

    R = B * S
    x2d = x.reshape(R, D).astype(jnp.bfloat16)                     # bf16 input stream

    # ---- kernel 1: fused QKV projection (K-tiled matmul) ----
    tr = _pick_row_tile(R, min(512, max(8, R // 2)))               # >= 2 parallel steps
    tk = _pick_k_tile(D)

    qkv = pl.pallas_call(
        _qkv_proj_kernel,
        out_shape=jax.ShapeDtypeStruct((R, 3 * Dp), jnp.bfloat16),
        grid_spec=pltpu.PrefetchScalarGridSpec(
            num_scalar_prefetch=0,
            grid=(R // tr, D // tk),
            in_specs=[
                pl.BlockSpec((tr, tk), lambda r, k: (r, k)),        # x rows
                pl.BlockSpec((tk, 3 * Dp), lambda r, k: (k, 0)),    # fused W^T tile
                pl.BlockSpec((1, 3 * Dp), lambda r, k: (0, 0)),     # fused bias
            ],
            out_specs=pl.BlockSpec((tr, 3 * Dp), lambda r, k: (r, 0)),
            scratch_shapes=[pltpu.VMEM((tr, 3 * Dp), jnp.float32)],
        ),
        compiler_params=pltpu.CompilerParams(
            dimension_semantics=("parallel", "arbitrary")),
    )(x2d, w_fused, b_fused)

    # ---- kernel 2: flash attention over kv tiles ----
    tq = _pick_row_tile(S, 512 if B >= 2 else min(512, max(8, S // 2)))
    tkv = _pick_row_tile(S, 512)
    nq, nk = S // tq, S // tkv

    out2d = pl.pallas_call(
        _flash_attn_kernel,
        out_shape=jax.ShapeDtypeStruct((R, Dp), x.dtype),
        grid_spec=pltpu.PrefetchScalarGridSpec(
            num_scalar_prefetch=0,
            grid=(B, nq, nk),
            in_specs=[
                # Q / K / V column blocks selected straight out of the fused slab
                pl.BlockSpec((tq, Dp), lambda b, qi, ki: (b * nq + qi, 0)),   # Q
                pl.BlockSpec((tkv, Dp), lambda b, qi, ki: (b * nk + ki, 1)),  # K
                pl.BlockSpec((tkv, Dp), lambda b, qi, ki: (b * nk + ki, 2)),  # V
            ],
            out_specs=pl.BlockSpec((tq, Dp), lambda b, qi, ki: (b * nq + qi, 0)),
            scratch_shapes=[
                pltpu.VMEM((tq, 1), jnp.float32),    # running max
                pltpu.VMEM((tq, 1), jnp.float32),    # running denominator
                pltpu.VMEM((tq, Dp), jnp.float32),   # output accumulator
            ],
        ),
        compiler_params=pltpu.CompilerParams(
            dimension_semantics=("parallel", "parallel", "arbitrary")),
    )(qkv, qkv, qkv)

    # Padded feature columns are exactly zero — slice them off, lane-dense store
    # already happened in-kernel.
    return out2d[:, :D].reshape(B, S, D)


# --------------------------------------------------------------------------
# Pure-JAX reference
# --------------------------------------------------------------------------
def attention_ref(x, wq, bq, wk, bk, wv, bv):
    D = x.shape[-1]
    q = x @ wq.T + bq
    k = x @ wk.T + bk
    v = x @ wv.T + bv
    scores = jnp.einsum("bsd,btd->bst", q, k) / (D ** 0.25)
    probs = jax.nn.softmax(scores, axis=-1)
    return jnp.einsum("bst,btd->bsd", probs, v)


if __name__ == "__main__":
    B, S, D = 2, 8, 32
    key = jax.random.PRNGKey(0)
    kx, kq, kbq, kk, kbk, kv, kbv = jax.random.split(key, 7)

    x = jax.random.normal(kx, (B, S, D), dtype=jnp.float32)

    # Deterministic parameter init mimicking nn.Linear default (uniform +-1/sqrt(D))
    bound = 1.0 / math.sqrt(D)
    wq = jax.random.uniform(kq, (D, D), jnp.float32, -bound, bound)
    bq = jax.random.uniform(kbq, (D,), jnp.float32, -bound, bound)
    wk = jax.random.uniform(kk, (D, D), jnp.float32, -bound, bound)
    bk = jax.random.uniform(kbk, (D,), jnp.float32, -bound, bound)
    wv = jax.random.uniform(kv, (D, D), jnp.float32, -bound, bound)
    bv = jax.random.uniform(kbv, (D,), jnp.float32, -bound, bound)

    out = attention_pallas(x, wq, bq, wk, bk, wv, bv)
    out = jax.block_until_ready(out)

    ref = attention_ref(x, wq, bq, wk, bk, wv, bv)
    assert out.shape == (B, S, D)
    # bf16 MXU inputs (x, W, P, V) with f32 accumulation -> loosened tolerance.
    assert jnp.allclose(out, ref, atol=5e-2, rtol=5e-2), "mismatch vs reference"

    print("KERNEL_OK")
</pallas_src>

<mosaic_0001>
module attributes {stable_mosaic.version = 11 : i64} {
  func.func @_qkv_proj_kernel(%arg0: i32, %arg1: i32, %arg2: memref<8x32xbf16, #tpu.memory_space<vmem>>, %arg3: memref<32x384xbf16, #tpu.memory_space<vmem>>, %arg4: memref<1x384xf32, #tpu.memory_space<vmem>>, %arg5: memref<8x384xbf16, #tpu.memory_space<vmem>>, %arg6: memref<8x384xf32, #tpu.memory_space<vmem>>) attributes {dimension_semantics = [#tpu.dimension_semantics<parallel>, #tpu.dimension_semantics<arbitrary>], iteration_bounds = array<i64: 2, 1>, scalar_prefetch = 0 : i64, scratch_operands = 1 : i64, tpu.core_type = #tpu.core_type<tc>, window_params = [{transform_indices = @transform_0, window_bounds = array<i64: 8, 32>}, {transform_indices = @transform_1, window_bounds = array<i64: 32, 384>}, {pipeline_mode = #tpu.pipeline_mode<synchronous>, transform_indices = @transform_2, window_bounds = array<i64: 1, 384>}, {transform_indices = @transform_3, window_bounds = array<i64: 8, 384>}]} {
    %c0_i32 = arith.constant 0 : i32
    %0 = arith.cmpi eq, %arg1, %c0_i32 : i32
    %1 = arith.extui %0 : i1 to i32
    %c0_i32_0 = arith.constant 0 : i32
    %2 = arith.cmpi ne, %1, %c0_i32_0 : i32
    scf.if %2 {
      %cst_10 = arith.constant 0.000000e+00 : f32
      %12 = vector.broadcast %cst_10 : f32 to vector<8x384xf32>
      %c0_11 = arith.constant 0 : index
      %c0_12 = arith.constant 0 : index
      %13 = vector.load %arg6[%c0_11, %c0_12] : memref<8x384xf32, #tpu.memory_space<vmem>>, vector<8x384xf32>
      tpu.vector_store %arg6[%c0_11, %c0_12], %12 {strides = array<i32>} : memref<8x384xf32, #tpu.memory_space<vmem>>, vector<8x384xf32>,
    } else {
    }
    %c0 = arith.constant 0 : index
    %c0_1 = arith.constant 0 : index
    %3 = vector.load %arg6[%c0, %c0_1] : memref<8x384xf32, #tpu.memory_space<vmem>>, vector<8x384xf32>
    %c0_2 = arith.constant 0 : index
    %c0_3 = arith.constant 0 : index
    %4 = vector.load %arg2[%c0_2, %c0_3] : memref<8x32xbf16, #tpu.memory_space<vmem>>, vector<8x32xbf16>
    %c0_4 = arith.constant 0 : index
    %c0_5 = arith.constant 0 : index
    %5 = vector.load %arg3[%c0_4, %c0_5] : memref<32x384xbf16, #tpu.memory_space<vmem>>, vector<32x384xbf16>
    %cst = arith.constant dense<0.000000e+00> : vector<8x384xf32>
    %6 = tpu.matmul %4, %5, %cst {dimension_numbers = #tpu.dot_dimension_numbers<[1], [0], [0], [1], [0, 0, 1, 1], [], []>} : vector<8x32xbf16>, vector<32x384xbf16>, vector<8x384xf32> -> vector<8x384xf32>
    %7 = arith.addf %3, %6 : vector<8x384xf32>
    %c0_6 = arith.constant 0 : index
    %c0_7 = arith.constant 0 : index
    %8 = vector.load %arg6[%c0_6, %c0_7] : memref<8x384xf32, #tpu.memory_space<vmem>>, vector<8x384xf32>
    tpu.vector_store %arg6[%c0_6, %c0_7], %7 {strides = array<i32>} : memref<8x384xf32, #tpu.memory_space<vmem>>, vector<8x384xf32>,
    %c0_i32_8 = arith.constant 0 : i32
    %9 = arith.cmpi eq, %arg1, %c0_i32_8 : i32
    %10 = arith.extui %9 : i1 to i32
    %c0_i32_9 = arith.constant 0 : i32
    %11 = arith.cmpi ne, %10, %c0_i32_9 : i32
    scf.if %11 {
      %c0_10 = arith.constant 0 : index
      %c0_11 = arith.constant 0 : index
      %12 = vector.load %arg6[%c0_10, %c0_11] : memref<8x384xf32, #tpu.memory_space<vmem>>, vector<8x384xf32>
      %c0_12 = arith.constant 0 : index
      %c0_13 = arith.constant 0 : index
      %13 = vector.load %arg4[%c0_12, %c0_13] : memref<1x384xf32, #tpu.memory_space<vmem>>, vector<1x384xf32>
      %14 = vector.broadcast %13 : vector<1x384xf32> to vector<8x384xf32>
      %15 = arith.addf %12, %14 : vector<8x384xf32>
      %16 = arith.truncf %15 : vector<8x384xf32> to vector<8x384xbf16>
      %c0_14 = arith.constant 0 : index
      %c0_15 = arith.constant 0 : index
      %17 = vector.load %arg5[%c0_14, %c0_15] : memref<8x384xbf16, #tpu.memory_space<vmem>>, vector<8x384xbf16>
      tpu.vector_store %arg5[%c0_14, %c0_15], %16 {strides = array<i32>} : memref<8x384xbf16, #tpu.memory_space<vmem>>, vector<8x384xbf16>,
    } else {
    }
    return
  }
  func.func @transform_0(%arg0: i32, %arg1: i32) -> (i32, i32) {
    %c0_i32 = arith.constant 0 : i32
    return %arg0, %arg1 : i32, i32
  }
  func.func @transform_1(%arg0: i32, %arg1: i32) -> (i32, i32) {
    %c0_i32 = arith.constant 0 : i32
    %c0_i32_0 = arith.constant 0 : i32
    return %arg1, %c0_i32 : i32, i32
  }
  func.func @transform_2(%arg0: i32, %arg1: i32) -> (i32, i32) {
    %c0_i32 = arith.constant 0 : i32
    %c0_i32_0 = arith.constant 0 : i32
    %c0_i32_1 = arith.constant 0 : i32
    return %c0_i32, %c0_i32_0 : i32, i32
  }
  func.func @transform_3(%arg0: i32, %arg1: i32) -> (i32, i32) {
    %c0_i32 = arith.constant 0 : i32
    %c0_i32_0 = arith.constant 0 : i32
    return %arg0, %c0_i32 : i32, i32
  }
}

</mosaic_0001>

<bundles_post_ra>
// kernel: tpu_custom_call.1
= control target key start
LH: loop header
LB: loop body
LE: loop exit
PB: predicated region body
PF: predicated region fallthrough
CT: control target
= control target key end

     0   :  { %8 = vsyncpa [#allocation4], 0  ;;  %s1032_s0 = inlined_call_operand.hbm [shape: bf16[16,32], index: 0, kind: input, shape index: {}]   ;;  %s1033_s1 = inlined_call_operand.hbm [shape: bf16[32,384], index: 1, kind: input, shape index: {}]   ;;  %s1034_s2 = inlined_call_operand.vmem [shape: f32[1,384], index: 2, kind: input, shape index: {}]   ;;  %s1035_s3 = inlined_call_operand.hbm [shape: bf16[16,384], index: 3, kind: output, shape index: {}]  }
   0x1   :  { %10 = vsyncpa [#allocation4 + $0x1], 0 }
   0x2   :  { %11 = vsyncpa [#allocation7], 0 }
   0x3   :  { %12 = vsyncpa [#allocation5], 0 }
   0x4   :  { %14 = vsyncpa [#allocation5 + $0x1], 0  ;;  %s814_s12 = smov 0   ;;  %s816_s13 = smov 0  }
   0x5   :  { %s818_s14 = smov 0   ;;  %s820_s15 = smov 0  }
   0x6   :  { %s822_s16 = smov 0   ;;  %s824_s17 = smov 0  }
   0x7 LB: > { %s516_s18 = sadd.s32 4294967295, %s784_s17   ;;  %s517_s19 = sadd.s32 4294967294, %s784_s17   ;;  %s784_s17 = sphi %s824_s17, %s20_s17   ;;  %s780_s16 = sphi %s822_s16, %s1059_s16   ;;  %s776_s15 = sphi %s820_s15, %s1058_s15   ;;  %s772_s14 = sphi %s818_s14, %s1057_s14   ;;  %s768_s13 = sphi %s816_s13, %s1056_s13   ;;  %s764_s12 = sphi %s814_s12, %s1055_s12  }
   0x8   : > { %p54_p0 = scmp.ne.s32.totalorder %s768_s13, %s764_s12  ;;  %p848_p1 = scmp.eq.s32.totalorder %s516_s18, 0 }
   0x9   : > { %p852_p2 = scmp.eq.s32.totalorder %s516_s18, 1  ;;  %p131_p3 = scmp.eq.s32.totalorder %s517_s19, 1 }
   0xa   : > { %s1040_s20 = scalar_select %p848_p1, 1, 0 }
   0xb   : > { %s1041_s21 = scalar_select %p852_p2, 1, 0 }
   0xc   : > { %p858_p4 = por %p848_p1, %p54_p0  ;;  %p518_p5 = scmp.ge.s32.totalorder %s784_s17, 1 }
   0xd   : > { %p863_p6 = por %p131_p3, %p54_p0  ;;  %p138_p7 = scmp.lt.s32.totalorder %s784_s17, 3 }
   0xe   : > { %s1042_s22 = scalar_select %p858_p4, 1, 0 }
   0xf   : > { %s1043_s23 = scalar_select %p863_p6, 1, 0 }
  0x10   : > { %p868_p8 = pnand %p518_p5, %p138_p7  ;;  %s786_s25 = smov [#allocation6]  }
  0x11   : > { %s154_s26 = sshll.u32 %s786_s25, 4  ;;  %s32_s28 = sadd.s32 1, %s780_s16  ;;  %s155_s26 = int_to_ptr.vmem [resolvable:$true] %s154_s26 }
  0x12   : > { %s1044_s24 = scalar_select %p868_p8, 1, 0 }
  0x13   : > { %p562_p9 = pneg %p868_p8  ;;  %s640_s4 = scalar_lea.hbm %s1033_s1, 768 }
  0x14   : > { %p641_p12 = scmp.ne.s32.totalorder %s1033_s1, %s640_s4  ;;  %p647_p5 = scmp.lt.u32.totalorder %s640_s4, %s1033_s1 }
  0x15   : > { %p877_p11 = pnand %p562_p9, %p848_p1 }
  0x17   : > { %p642_p13 = pneg %p877_p11 }
  0x19   : > { %p643_p0 = pnand %p642_p13, %p641_p12 }
  0x1b   : > { %p644_p3 = pneg %p643_p0 }
  0x1d   : > { %p649_p7 = pnand %p647_p5, %p644_p3 }
  0x1f   : > { %652 = shalt.err (!%p649_p7)
}
  0x20   : > { %s653_s9 = scalar_lea.vmem %s155_s26, 768  ;;  %p661_p1 = scmp.lt.s32.totalorder %s155_s26, %s155_s26 }
  0x21   : > { %p654_p9 = scmp.ne.s32.totalorder %s155_s26, %s653_s9  ;;  %p662_p4 = scmp.lt.s32.totalorder %s653_s9, %s653_s9 }
  0x23   : > { %p656_p10 = pnand %p654_p9, %p642_p13  ;;  %p663_p8 = por %p662_p4, %p661_p1 }
  0x25   : > { %p657_p6 = pneg %p656_p10 }
  0x27   : > { %p664_p2 = pnand %p663_p8, %p657_p6 }
  0x29   : > { %667 = shalt.err (!%p664_p2)
}
  0x2a   : > { %s787_s10 = smov 192   ;;  %s788_s11 = smov 12  }
  0x2b   : > { %565 = dma.hbm_to_vmem [thread:$0]  (!%p877_p11), %s1033_s1, 768, %s155_s26, [#allocation7], %s787_s10, %s787_s10, %s788_s11  }
  0x2c   : > { %p34_p1 = scmp.ge.s32.totalorder %s32_s28, 2  ;;  %s41_s25 = sadd.s32 1, %s772_s14 }
  0x2d   : > { %p48_p2 = scmp.ne.s32.totalorder %s772_s14, %s768_s13  ;;  %p49_p4 = scmp.eq.s32.totalorder %s784_s17, 0 }
  0x2e   : > { %s1061_s28 = smov (%p34_p1, %s32_s28), 0  ;;  %p1047_p8 = scmp.ne.s32.totalorder %s1041_s21, 0 }
  0x2f   : > { %p904_p6 = por %p49_p4, %p48_p2  ;;  %s36_s27 = ssub.s32 %s780_s16, %s1061_s28 }
  0x30   : > { %p910_p10 = por %p1047_p8, %p48_p2  ;;  %p575_p12 = scmp.lt.s32.totalorder %s784_s17, 2 }
  0x31   : > { %p39_p11 = scmp.eq.s32.totalorder %s36_s27, 0  ;;  %s171_s26 = sand.u32 1, %s772_s14  }
  0x32   : > { %s521_s4 = sshll.u32 %s171_s26, 2  ;;  %s522_s6 = sshll.u32 %s780_s16, 6 }
  0x33   : > { %s919_s5 = scalar_select %p39_p11, %s772_s14, %s41_s25  }
  0x34   : > { %s925_s9 = scalar_lea.hbm %s1032_s0, %s522_s6  ;;  %s175_s21 = scalar_lea.vmem [#allocation3], %s521_s4 }
  0x35   : > { %s183_s10 = sshll.u32 %s175_s21, 4  ;;  %p931_p13 = pnand %p575_p12, %p904_p6  ;;  %s927_s10 = int_to_ptr.vmem [resolvable:$true] %s183_s10 }
  0x36   : > { %s172_s18 = scalar_lea.sflag [#allocation4], %s171_s26  ;;  %s668_s19 = scalar_lea.hbm %s925_s9, 64 }
  0x37   : > { %p669_p0 = scmp.ne.s32.totalorder %s925_s9, %s668_s19  ;;  %p670_p3 = pneg %p931_p13 }
  0x38   : > { %s673_s4 = scalar_lea.hbm %s1032_s0, 128  ;;  %p674_p9 = scmp.lt.u32.totalorder %s925_s9, %s1032_s0 }
  0x39   : > { %p671_p5 = pnand %p670_p3, %p669_p0  ;;  %p675_p1 = scmp.lt.u32.totalorder %s673_s4, %s668_s19 }
  0x3a   : > { %p677_p4 = scmp.lt.u32.totalorder %s668_s19, %s925_s9 }
  0x3b   : > { %p672_p7 = pneg %p671_p5  ;;  %p676_p2 = por %p675_p1, %p674_p9 }
  0x3d   : > { %p678_p6 = por %p677_p4, %p676_p2 }
  0x3f   : > { %p679_p8 = pnand %p678_p6, %p672_p7 }
  0x41   : > { %682 = shalt.err (!%p679_p8)
}
  0x42   : > { %s683_s26 = scalar_lea.vmem %s927_s10, 64  ;;  %s789_s7 = smov [#allocation3]  }
  0x43   : > { %p684_p12 = scmp.ne.s32.totalorder %s927_s10, %s683_s26  ;;  %s688_s8 = sshll.u32 %s789_s7, 4  ;;  %s689_s8 = int_to_ptr.vmem [resolvable:$false] %s688_s8 }
  0x44   : > { %s690_s21 = scalar_lea.vmem %s689_s8, 128  ;;  %p691_p5 = scmp.lt.s32.totalorder %s927_s10, %s689_s8 }
  0x45   : > { %p686_p11 = pnand %p684_p12, %p670_p3  ;;  %p692_p9 = scmp.lt.s32.totalorder %s690_s21, %s683_s26 }
  0x47   : > { %p687_p0 = pneg %p686_p11  ;;  %p693_p1 = por %p692_p9, %p691_p5 }
  0x49   : > { %p694_p2 = pnand %p693_p1, %p687_p0 }
  0x4b   : > { %697 = shalt.err (!%p694_p2)
}
  0x4c   : > { %569 = dma.hbm_to_vmem [thread:$0]  (!%p931_p13), %s925_s9, 64, %s927_s10, %s172_s18  }
  0x4d   : > { %p1050_p7 = scmp.ne.s32.totalorder %s1044_s24, 0 }
  0x4e   : > { %s963_s19 = sand.u32 (!%p1050_p7), 1, %s768_s13   ;;  %p1051_p3 = scmp.ne.s32.totalorder (!%p1050_p7), %s1042_s22, 0 }
  0x4f   : > { %192 = sbr.rel (%p1050_p7) target bundleno = 331 (0x14b), region = 32  ;;  %s524_s25 = sshll.u32 (!%p1050_p7), %s963_s19, 2 }
  0x50   : > { %s195_s27 = scalar_lea.sflag (!%p1050_p7), [#allocation4], %s963_s19  ;;  %s198_s4 = scalar_lea.vmem (!%p1050_p7), [#allocation3], %s524_s25 }
  0x56   : > { %751 = dma.done.wait (%p1051_p3), %s195_s27, 64  }
  0x57   : > { %753 = vsyncadd (%p1051_p3), %s195_s27, 4294967232  ;;  %p1052_p4 = scmp.ne.s32.totalorder %s1040_s20, 0 }
  0x59   : > { %755 = dma.done.wait (%p1052_p4), [#allocation7], 768  }
  0x5a   : > { %757 = vsyncadd (%p1052_p4), [#allocation7], 4294966528  ;;  %v790_v0 = vmov 0.0   ;;  %vm791_vm0 = vmmov 0   ;;  %v792_v1 = vmov 0   ;;  %vm278_vm1 = vcmask 261120  }
  0x5b   : > { %544 = vmatprep.subr.bf16.mxu1 %v790_v0  ;;  %548 = vmatprep.mubr.msk.bf16.mxu1 %vm791_vm0, %v790_v0  ;;  %v632_v2 = vld [vmem:[#allocation6 + $0x4] ss:$12 sps:$4 sm:$0xff]   ;;  %v634_v3 = vld [vmem:[#allocation6 + $0x8] ss:$12 sps:$4 sm:$0xff]   ;;  %v635_v4 = vld [vmem:[#allocation6] ss:$12 sps:$4 sm:$0xff]   ;;  %v377_v9 = vlaneseq }
  0x5c   : > { %314 = vmatprep.mubr.bf16.mxu0 %v792_v1  ;;  %282 = vmatprep.subr.bf16.mxu0 %v632_v2  ;;  %v636_v5 = vld [vmem:[#allocation6 + $0x1c] ss:$12 sps:$4 sm:$0xff]   ;;  %v638_v6 = vld [vmem:[#allocation6 + $0x20] ss:$12 sps:$4 sm:$0xff]   ;;  %v639_v7 = vld [vmem:[#allocation6 + $0x18] ss:$12 sps:$4 sm:$0xff]  }
  0x5d   : > { %545 = vmatpush3.bf16.msra.mxu1 %v634_v3  ;;  %283 = vmatpush1.bf16.msra.mxu0 %v635_v4  ;;  %v237_v8 = vld [vmem:[%s198_s4] sm:$0xf]  ;;  %v378_v10 = vshrl.u32 %v377_v9, 7  ;;  %s552_s24 = smul.u32 12, %s963_s19  ;;  %s793_s7 = smov [#allocation8]  }
  0x5e   : > { %546 = vmatprep.subr.bf16.mxu1 %v790_v0  ;;  %284 = vmatprep.subr.bf16.mxu0 %v636_v5  ;;  %v375_v12 = vld [vmem:[%s1034_s2] sm:$0x7]  ;;  %s553_s9 = smul.u32 192, %s776_s15  ;;  %s411_s15 = scalar_lea.sflag [#allocation5], %s963_s19 }
  0x5f   : > { %v387_v11 = vsub.s32 2, %v378_v10  ;;  %v379_v13 = vsub.s32 0, %v378_v10  ;;  %v383_v14 = vsub.s32 1, %v378_v10  ;;  %s224_s10 = scalar_lea.vmem [#allocation8], %s552_s24  ;;  %s702_s8 = sshll.u32 %s793_s7, 4  ;;  %s703_s8 = int_to_ptr.vmem [resolvable:$false] %s702_s8 }
  0x60   : > { %s425_s11 = sshll.u32 %s224_s10, 4  ;;  %s983_s6 = scalar_lea.hbm %s1035_s3, %s553_s9  ;;  %s985_s11 = int_to_ptr.vmem [resolvable:$true] %s425_s11 }
  0x61   : > { %547 = vmatpush3.bf16.msra.mxu1 %v638_v6  ;;  %285 = vmatpush1.bf16.msra.mxu0 %v639_v7  ;;  %v388_v15 = vrot.slane %v375_v12, %v387_v11  ;;  %v380_v16 = vrot.slane %v375_v12, %v379_v13  ;;  %v384_v17 = vrot.slane %v375_v12, %v383_v14  ;;  %s698_s26 = scalar_lea.vmem %s985_s11, 192  ;;  %s704_s21 = scalar_lea.vmem %s703_s8, 384 }
  0x62   : > { %p699_p13 = scmp.ne.s32.totalorder %s985_s11, %s698_s26  ;;  %p705_p12 = scmp.lt.s32.totalorder %s985_s11, %s703_s8 }
  0x63   : > { %p706_p11 = scmp.lt.s32.totalorder %s704_s21, %s698_s26 }
  0x64   : > { %549 = vmatmul.mubr.msk.bf16.vlgmr.msra.gmra.mrb[0].mxu1 %vm278_vm1, %v237_v8  ;;  %532 = vmatmul.mubr.msk.bf16.vlgmr.msra.gmra.mrb[0].mxu0 %vm278_vm1, %v237_v8  ;;  %p700_p6 = pnand %p699_p13, %p910_p10 }
  0x65   : > { %p707_p0 = por %p706_p11, %p705_p12 }
  0x66   : > { %p701_p8 = pneg %p700_p6 }
  0x68   : > { %p708_p5 = pnand %p707_p0, %p701_p8 }
 0x137   : > { %v357_v18 = vpop.f32.mrb[0].mxu1  ;;  %v316_v20 = vpop.f32.mrb[0].mxu0 }
 0x138   : > { %v394_v19 = vadd.f32 %v388_v15, %v357_v18  ;;  %v550_v21 = vpop.f32.mrb[1].mxu1  ;;  %v392_v22 = vadd.f32 %v380_v16, %v316_v20  ;;  %v318_v23 = vpop.f32.mrb[1].mxu0 }
 0x139   : > { %v360_v24 = vpop.f32.mrb[2].mxu1  ;;  %v393_v26 = vadd.f32 %v384_v17, %v318_v23  ;;  %v320_v27 = vpop.f32.mrb[2].mxu0 }
 0x13a   : > { %v540_v25 = vpack.c.bf16 %v394_v19, %v394_v19  ;;  %v551_v28 = vpop.f32.mrb[3].mxu1  ;;  %v321_v29 = vpop.f32.mrb[3].mxu0 }
 0x13b   : > { %v539_v30 = vpack.c.bf16 %v393_v26, %v392_v22 }
 0x13c   : > { %409 = vst [vmem:[%s224_s10 + $0x8] sm:$0xf] %v540_v25 }
 0x13d   : > { %408 = vst [vmem:[%s224_s10] sm:$0xff] %v539_v30 }
 0x13e   : > { %711 = shalt.err (!%p708_p5)
}
 0x13f   : > { %s712_s19 = scalar_lea.hbm %s983_s6, 192  ;;  %s716_s4 = scalar_lea.hbm %s1035_s3, 384 }
 0x140   : > { %p713_p9 = scmp.ne.s32.totalorder %s983_s6, %s712_s19  ;;  %p717_p7 = scmp.lt.u32.totalorder %s983_s6, %s1035_s3 }
 0x141   : > { %p718_p3 = scmp.lt.u32.totalorder %s716_s4, %s712_s19  ;;  %p720_p13 = scmp.lt.u32.totalorder %s712_s19, %s983_s6 }
 0x142   : > { %p714_p1 = pnand %p713_p9, %p910_p10 }
 0x143   : > { %p719_p4 = por %p718_p3, %p717_p7 }
 0x144   : > { %p715_p2 = pneg %p714_p1 }
 0x145   : > { %p721_p6 = por %p720_p13, %p719_p4 }
 0x147   : > { %p722_p8 = pnand %p721_p6, %p715_p2 }
 0x149   : > { %725 = shalt.err (!%p722_p8)
}
 0x14a   : > { %560 = dma.vmem_to_hbm [thread:$0]  (%p910_p10), %s985_s11, 192, %s983_s6, %s411_s15  }
 0x14b PF: > { %s437_s24 = sand.u32 1, %s764_s12   ;;  %p1053_p12 = scmp.ne.s32.totalorder %s1043_s23, 0 }
 0x14c   : > { %p1054_p11 = scmp.ge.s32.totalorder %s784_s17, 2  ;;  %s438_s9 = scalar_lea.sflag [#allocation5], %s437_s24 }
 0x14e   : > { %p571_p0 = pnand %p1054_p11, %p1053_p12 }
 0x150   : > { %759 = dma.done.wait (!%p571_p0), %s438_s9, 192  }
 0x151   : > { %761 = vsyncadd (!%p571_p0), %s438_s9, 4294967104  ;;  %s20_s17 = sadd.s32 1, %s784_s17   ;;  %s1055_s12 = smov %s768_s13 }
 0x152   : > { %p17_p5 = scmp.ge.s32.totalorder %s20_s17, 4   ;;  %s1056_s13 = smov %s772_s14 }
 0x153   : > { %s1057_s14 = smov %s919_s5  ;;  %s1058_s15 = smov %s780_s16 }
 0x154   : > { %s1059_s16 = smov %s1061_s28  ;;  %19 = sbr.rel (!%p17_p5) target bundleno = 7 (0x7), region = 90 }
 0x15b   :  { %443 = vsyncpa [#allocation4], 1 }
 0x15c   :  { %445 = vsyncpa [#allocation4 + $0x1], 1 }
 0x15d   :  { %446 = vsyncpa [#allocation7], 1 }
 0x15e   :  { %447 = vsyncpa [#allocation5], 1 }
 0x15f   :  { %449 = vsyncpa [#allocation5 + $0x1], 1 }

</bundles_post_ra>
